<compile_context>
chip_gen: v6e
topology: v6e:2x2x1
jax: 0.10.0
libtpu: 0.0.40
codegen_flags: <defaults>
</compile_context>

<pallas_src>
import functools

import jax
import jax.numpy as jnp
import numpy as np
from jax import lax
from jax.experimental import pallas as pl
from jax.experimental.pallas import tpu as pltpu


_LANE = 128
_BLOCK_BYTES = 4 * 1024 * 1024       # ~4 MiB per input per grid step
_MAX_TILE_ROWS = 2048                # bounds accumulator / temp VMEM footprint
_UNROLL_CHUNKS = 8                   # Python-unroll threshold for the lane fold


def _round_up(x, m):
    return ((x + m - 1) // m) * m


def _sublane_multiple(dtype):
    isz = np.dtype(dtype).itemsize
    return max(8, (4 // max(isz, 1)) * 8)   # f32 -> 8, bf16 -> 16, int8/fp8 -> 32


# ---------------------------------------------------------------------------
# Kernel: grid = (n_row_tiles, n_col_tiles); column axis is the reduction.
# ---------------------------------------------------------------------------
def _mse_kernel(pred_ref, gt_ref, num_ref, den_ref, sq_acc, gt_acc, *,
                n_rows, inv_hw, tile_rows, tile_cols, n_col_tiles, last_valid):
    i = pl.program_id(0)
    j = pl.program_id(1)
    last_j = n_col_tiles - 1

    full_all = tile_cols // _LANE        # full 128-lane chunks in interior tiles
    full_last = last_valid // _LANE      # full chunks in the last column tile
    rem = last_valid % _LANE             # trailing (<128) valid columns, last tile

    @pl.when(j == 0)
    def _():
        sq_acc[...] = jnp.zeros_like(sq_acc)
        gt_acc[...] = jnp.zeros_like(gt_acc)

    def load_chunk(off, width):
        g_c = gt_ref[:, pl.ds(off, width)].astype(jnp.float32)
        d_c = pred_ref[:, pl.ds(off, width)].astype(jnp.float32) - g_c
        return d_c, g_c

    def accumulate(n_full):
        """Fold n_full 128-lane chunks into the (tile_rows, 128) accumulators."""
        if n_full <= 0:
            return
        if n_full <= _UNROLL_CHUNKS:
            d_c, g_c = load_chunk(0, _LANE)
            sq_t = d_c * d_c
            gt_t = g_c
            for c in range(1, n_full):
                d_c, g_c = load_chunk(c * _LANE, _LANE)
                sq_t = sq_t + d_c * d_c
                gt_t = gt_t + g_c
            sq_acc[...] += sq_t
            gt_acc[...] += gt_t
        else:
            def body(c, carry):
                off = pl.multiple_of(c * _LANE, _LANE)
                d_c, g_c = load_chunk(off, _LANE)
                sq_acc[...] += d_c * d_c
                gt_acc[...] += g_c
                return carry
            lax.fori_loop(0, n_full, body, 0)

    if full_all == full_last:
        accumulate(full_all)             # every column tile has the same shape
    else:
        @pl.when(j < last_j)
        def _():
            accumulate(full_all)

        @pl.when(j == last_j)
        def _():
            accumulate(full_last)

    @pl.when(j == last_j)
    def _():
        row_sq = jnp.sum(sq_acc[...], axis=-1, keepdims=True)     # (tile_rows, 1)
        row_gt = jnp.sum(gt_acc[...], axis=-1, keepdims=True)
        if rem > 0:                      # trailing <128 columns (static slice)
            d_r, g_r = load_chunk(full_last * _LANE, rem)
            row_sq = row_sq + jnp.sum(d_r * d_r, axis=-1, keepdims=True)
            row_gt = row_gt + jnp.sum(g_r, axis=-1, keepdims=True)

        hit = row_gt > 0.0               # gt.sum(H,W) > 0  (per heatmap)
        if n_rows % tile_rows != 0:      # NaN-safe mask of padded rows (rare)
            row_ids = (lax.broadcasted_iota(jnp.int32, (tile_rows, 1), 0)
                       + i * tile_rows)
            hit = jnp.logical_and(hit, row_ids < n_rows)

        num = jnp.sum(jnp.where(hit, row_sq * inv_hw, 0.0))
        den = jnp.sum(jnp.where(hit, 1.0, 0.0))
        num_ref[...] = jnp.full(num_ref.shape, num, jnp.float32)
        den_ref[...] = jnp.full(den_ref.shape, den, jnp.float32)


# ---------------------------------------------------------------------------
# Wrapper
# ---------------------------------------------------------------------------
@functools.partial(jax.jit, static_argnames=("max_single_hw",))
def heatmap_loss_mse(pred, gt, max_single_hw=65536):
    """HeatmapLoss(loss_type='MSE').forward(pred, gt) for NCHW inputs."""
    assert pred.shape == gt.shape, (
        f"pred, gt heatmap size mismatch: {pred.shape}|{gt.shape}")
    B, C, H, W = pred.shape
    BC, HW = B * C, H * W

    # Stream in native dtype (reshape of a contiguous NCHW array is free).
    p2 = pred.reshape(BC, HW)
    g2 = gt.reshape(BC, HW)

    isz_p = np.dtype(pred.dtype).itemsize
    isz_g = np.dtype(gt.dtype).itemsize
    isz = max(isz_p, isz_g)
    sub = max(_sublane_multiple(pred.dtype), _sublane_multiple(gt.dtype))
    inv_hw = 1.0 / float(HW)

    # --- column tiling ------------------------------------------------------
    single_pass = (HW <= max_single_hw) and (HW * isz * sub <= _BLOCK_BYTES)
    if single_pass:
        tile_cols = HW                    # full lane extent (any width is legal)
        n_col_tiles = 1
    else:
        tile_cols = max(_LANE, min(2048, (HW // _LANE) * _LANE))
        n_col_tiles = pl.cdiv(HW, tile_cols)
    last_valid = HW - (n_col_tiles - 1) * tile_cols

    # --- row tiling (byte-based budget, sublane-packed) ----------------------
    tile_rows = _BLOCK_BYTES // max(tile_cols * isz, 1)
    tile_rows = max(sub, (tile_rows // sub) * sub)
    tile_rows = min(tile_rows, _MAX_TILE_ROWS, _round_up(BC, sub))
    if BC > sub:                          # >= 2 row tiles -> both v7x TCs busy
        tile_rows = min(tile_rows, _round_up(pl.cdiv(BC, 2), sub))
    if tile_rows >= BC:                   # single row tile: use the exact extent
        tile_rows = BC
    n_row_tiles = pl.cdiv(BC, tile_rows)

    kernel = functools.partial(
        _mse_kernel, n_rows=BC, inv_hw=inv_hw, tile_rows=tile_rows,
        tile_cols=tile_cols, n_col_tiles=n_col_tiles, last_valid=last_valid)

    grid_spec = pltpu.PrefetchScalarGridSpec(
        num_scalar_prefetch=0,
        grid=(n_row_tiles, n_col_tiles),
        in_specs=[
            pl.BlockSpec((tile_rows, tile_cols), lambda i, j: (i, j)),
            pl.BlockSpec((tile_rows, tile_cols), lambda i, j: (i, j)),
        ],
        out_specs=[
            pl.BlockSpec((1, 8, _LANE), lambda i, j: (i, 0, 0)),
            pl.BlockSpec((1, 8, _LANE), lambda i, j: (i, 0, 0)),
        ],
        scratch_shapes=[
            pltpu.VMEM((tile_rows, _LANE), jnp.float32),   # sq-err lane accumulator
            pltpu.VMEM((tile_rows, _LANE), jnp.float32),   # gt-sum lane accumulator
        ],
    )

    out_shape = (
        jax.ShapeDtypeStruct((n_row_tiles, 8, _LANE), jnp.float32),   # num partials
        jax.ShapeDtypeStruct((n_row_tiles, 8, _LANE), jnp.float32),   # den partials
    )
    cost = pl.CostEstimate(
        flops=3 * BC * HW,
        transcendentals=0,
        bytes_accessed=BC * HW * (isz_p + isz_g) + 2 * n_row_tiles * 8 * _LANE * 4,
    )
    cparams = pltpu.CompilerParams(
        dimension_semantics=("parallel", "arbitrary"),
        vmem_limit_bytes=48 * 1024 * 1024,
    )

    num_out, den_out = pl.pallas_call(
        kernel,
        out_shape=out_shape,
        grid_spec=grid_spec,
        compiler_params=cparams,
        cost_estimate=cost,
    )(p2, g2)

    num = jnp.sum(num_out[:, 0, 0])
    den = jnp.sum(den_out[:, 0, 0])
    return num / den     # NaN when no heatmap is non-empty (matches PyTorch)


# ---------------------------------------------------------------------------
# Reference + tests
# ---------------------------------------------------------------------------
def _ref_mse(pred, gt):
    pred = pred.astype(jnp.float32)
    gt = gt.astype(jnp.float32)
    mask = (gt.sum(axis=3).sum(axis=2) > 0).astype(jnp.float32)
    return (((pred - gt) ** 2).mean(axis=3).mean(axis=2) * mask).sum() / mask.sum()


if __name__ == "__main__":
    key = jax.random.PRNGKey(0)

    # --- Test 1: standard shapes, single column tile, some empty heatmaps ---
    k1, k2, k3, key = jax.random.split(key, 4)
    B, C, H, W = 2, 4, 16, 16
    pred1 = jax.random.uniform(k1, (B, C, H, W), dtype=jnp.float32)
    gt1 = jax.random.uniform(k2, (B, C, H, W), dtype=jnp.float32)
    ch_mask1 = (jax.random.uniform(k3, (B, C, 1, 1)) > 0.4).astype(jnp.float32)
    gt1 = gt1 * ch_mask1
    loss1 = jax.block_until_ready(heatmap_loss_mse(pred1, gt1))
    ref1 = _ref_mse(pred1, gt1)
    assert np.allclose(np.asarray(loss1), np.asarray(ref1), rtol=1e-5, atol=1e-6), (loss1, ref1)

    # --- Test 2: odd shapes (BC=6 rows, HW=120 < 128 lane width) ------------
    k1, k2, key = jax.random.split(key, 3)
    pred2 = jax.random.uniform(k1, (2, 3, 10, 12), dtype=jnp.float32)
    gt2 = jax.random.uniform(k2, (2, 3, 10, 12), dtype=jnp.float32)
    gt2 = gt2.at[1, 2].set(0.0)                        # one empty heatmap
    loss2 = jax.block_until_ready(heatmap_loss_mse(pred2, gt2))
    ref2 = _ref_mse(pred2, gt2)
    assert np.allclose(np.asarray(loss2), np.asarray(ref2), rtol=1e-5, atol=1e-6), (loss2, ref2)

    # --- Test 3: force the multi-column-tile path incl. column remainder ----
    k1, k2, k3, key = jax.random.split(key, 4)
    pred3 = jax.random.uniform(k1, (2, 4, 20, 20), dtype=jnp.float32)   # HW = 400
    gt3 = jax.random.uniform(k2, (2, 4, 20, 20), dtype=jnp.float32)
    ch_mask3 = (jax.random.uniform(k3, (2, 4, 1, 1)) > 0.4).astype(jnp.float32)
    gt3 = gt3 * ch_mask3
    loss3 = jax.block_until_ready(heatmap_loss_mse(pred3, gt3, max_single_hw=128))
    ref3 = _ref_mse(pred3, gt3)
    assert np.allclose(np.asarray(loss3), np.asarray(ref3), rtol=1e-5, atol=1e-6), (loss3, ref3)

    # --- Test 4: native bf16 streaming (16-row sublane packing, row padding) -
    k1, k2, k3, key = jax.random.split(key, 4)
    pred4 = jax.random.uniform(k1, (2, 4, 16, 16), dtype=jnp.float32).astype(jnp.bfloat16)
    gt4 = jax.random.uniform(k2, (2, 4, 16, 16), dtype=jnp.float32)
    ch_mask4 = (jax.random.uniform(k3, (2, 4, 1, 1)) > 0.4).astype(jnp.float32)
    gt4 = (gt4 * ch_mask4).astype(jnp.bfloat16)
    loss4 = jax.block_until_ready(heatmap_loss_mse(pred4, gt4))
    ref4 = _ref_mse(pred4, gt4)
    assert np.allclose(np.asarray(loss4), np.asarray(ref4), rtol=1e-4, atol=1e-5), (loss4, ref4)

    print("KERNEL_OK")
</pallas_src>

<mosaic_0001>
module attributes {stable_mosaic.version = 11 : i64} {
  func.func @_mse_kernel(%arg0: i32, %arg1: i32, %arg2: memref<8x256xf32, #tpu.memory_space<vmem>>, %arg3: memref<8x256xf32, #tpu.memory_space<vmem>>, %arg4: memref<1x8x128xf32, #tpu.memory_space<vmem>>, %arg5: memref<1x8x128xf32, #tpu.memory_space<vmem>>, %arg6: memref<8x128xf32, #tpu.memory_space<vmem>>, %arg7: memref<8x128xf32, #tpu.memory_space<vmem>>) attributes {dimension_semantics = [#tpu.dimension_semantics<parallel>, #tpu.dimension_semantics<arbitrary>], iteration_bounds = array<i64: 1, 1>, scalar_prefetch = 0 : i64, scratch_operands = 2 : i64, tpu.core_type = #tpu.core_type<tc>, window_params = [{transform_indices = @transform_0, window_bounds = array<i64: 8, 256>}, {transform_indices = @transform_1, window_bounds = array<i64: 8, 256>}, {transform_indices = @transform_2, window_bounds = array<i64: 1, 8, 128>}, {transform_indices = @transform_3, window_bounds = array<i64: 1, 8, 128>}]} {
    %c0_i32 = arith.constant 0 : i32
    %0 = arith.cmpi eq, %arg1, %c0_i32 : i32
    %1 = arith.extui %0 : i1 to i32
    %c0_i32_0 = arith.constant 0 : i32
    %2 = arith.cmpi ne, %1, %c0_i32_0 : i32
    scf.if %2 {
      %cst = arith.constant 0.000000e+00 : f32
      %22 = vector.broadcast %cst : f32 to vector<8x128xf32>
      %c0_17 = arith.constant 0 : index
      %c0_18 = arith.constant 0 : index
      %23 = vector.load %arg6[%c0_17, %c0_18] : memref<8x128xf32, #tpu.memory_space<vmem>>, vector<8x128xf32>
      tpu.vector_store %arg6[%c0_17, %c0_18], %22 {strides = array<i32>} : memref<8x128xf32, #tpu.memory_space<vmem>>, vector<8x128xf32>,
      %cst_19 = arith.constant 0.000000e+00 : f32
      %24 = vector.broadcast %cst_19 : f32 to vector<8x128xf32>
      %c0_20 = arith.constant 0 : index
      %c0_21 = arith.constant 0 : index
      %25 = vector.load %arg7[%c0_20, %c0_21] : memref<8x128xf32, #tpu.memory_space<vmem>>, vector<8x128xf32>
      tpu.vector_store %arg7[%c0_20, %c0_21], %24 {strides = array<i32>} : memref<8x128xf32, #tpu.memory_space<vmem>>, vector<8x128xf32>,
    } else {
    }
    %c0 = arith.constant 0 : index
    %c0_1 = arith.constant 0 : index
    %3 = vector.load %arg3[%c0, %c0_1] : memref<8x256xf32, #tpu.memory_space<vmem>>, vector<8x128xf32>
    %c0_2 = arith.constant 0 : index
    %c0_3 = arith.constant 0 : index
    %4 = vector.load %arg2[%c0_2, %c0_3] : memref<8x256xf32, #tpu.memory_space<vmem>>, vector<8x128xf32>
    %5 = arith.subf %4, %3 : vector<8x128xf32>
    %6 = arith.mulf %5, %5 : vector<8x128xf32>
    %c0_4 = arith.constant 0 : index
    %c128 = arith.constant 128 : index
    %7 = vector.load %arg3[%c0_4, %c128] : memref<8x256xf32, #tpu.memory_space<vmem>>, vector<8x128xf32>
    %c0_5 = arith.constant 0 : index
    %c128_6 = arith.constant 128 : index
    %8 = vector.load %arg2[%c0_5, %c128_6] : memref<8x256xf32, #tpu.memory_space<vmem>>, vector<8x128xf32>
    %9 = arith.subf %8, %7 : vector<8x128xf32>
    %10 = arith.mulf %9, %9 : vector<8x128xf32>
    %11 = arith.addf %6, %10 : vector<8x128xf32>
    %12 = arith.addf %3, %7 : vector<8x128xf32>
    %c0_7 = arith.constant 0 : index
    %c0_8 = arith.constant 0 : index
    %13 = vector.load %arg6[%c0_7, %c0_8] : memref<8x128xf32, #tpu.memory_space<vmem>>, vector<8x128xf32>
    %14 = arith.addf %13, %11 : vector<8x128xf32>
    %c0_9 = arith.constant 0 : index
    %c0_10 = arith.constant 0 : index
    %15 = vector.load %arg6[%c0_9, %c0_10] : memref<8x128xf32, #tpu.memory_space<vmem>>, vector<8x128xf32>
    tpu.vector_store %arg6[%c0_9, %c0_10], %14 {strides = array<i32>} : memref<8x128xf32, #tpu.memory_space<vmem>>, vector<8x128xf32>,
    %c0_11 = arith.constant 0 : index
    %c0_12 = arith.constant 0 : index
    %16 = vector.load %arg7[%c0_11, %c0_12] : memref<8x128xf32, #tpu.memory_space<vmem>>, vector<8x128xf32>
    %17 = arith.addf %16, %12 : vector<8x128xf32>
    %c0_13 = arith.constant 0 : index
    %c0_14 = arith.constant 0 : index
    %18 = vector.load %arg7[%c0_13, %c0_14] : memref<8x128xf32, #tpu.memory_space<vmem>>, vector<8x128xf32>
    tpu.vector_store %arg7[%c0_13, %c0_14], %17 {strides = array<i32>} : memref<8x128xf32, #tpu.memory_space<vmem>>, vector<8x128xf32>,
    %c0_i32_15 = arith.constant 0 : i32
    %19 = arith.cmpi eq, %arg1, %c0_i32_15 : i32
    %20 = arith.extui %19 : i1 to i32
    %c0_i32_16 = arith.constant 0 : i32
    %21 = arith.cmpi ne, %20, %c0_i32_16 : i32
    scf.if %21 {
      %c0_17 = arith.constant 0 : index
      %c0_18 = arith.constant 0 : index
      %22 = vector.load %arg6[%c0_17, %c0_18] : memref<8x128xf32, #tpu.memory_space<vmem>>, vector<8x128xf32>
      %cst = arith.constant dense<0.000000e+00> : vector<8xf32>
      %23 = vector.multi_reduction <add>, %22, %cst [1] : vector<8x128xf32> to vector<8xf32>
      %24 = vector.shape_cast %23 : vector<8xf32> to vector<8x1xf32>
      %c0_19 = arith.constant 0 : index
      %c0_20 = arith.constant 0 : index
      %25 = vector.load %arg7[%c0_19, %c0_20] : memref<8x128xf32, #tpu.memory_space<vmem>>, vector<8x128xf32>
      %cst_21 = arith.constant dense<0.000000e+00> : vector<8xf32>
      %26 = vector.multi_reduction <add>, %25, %cst_21 [1] : vector<8x128xf32> to vector<8xf32>
      %27 = vector.shape_cast %26 : vector<8xf32> to vector<8x1xf32>
      %cst_22 = arith.constant 0.000000e+00 : f32
      %28 = vector.broadcast %cst_22 : f32 to vector<8x1xf32>
      %29 = arith.cmpf ogt, %27, %28 : vector<8x1xf32>
      %cst_23 = arith.constant 3.906250e-03 : f32
      %30 = vector.broadcast %cst_23 : f32 to vector<8x1xf32>
      %31 = arith.mulf %24, %30 : vector<8x1xf32>
      %cst_24 = arith.constant 0.000000e+00 : f32
      %32 = vector.broadcast %cst_24 : f32 to vector<8x1xf32>
      %33 = arith.select %29, %31, %32 : vector<8x1xi1>, vector<8x1xf32>
      %34 = vector.shape_cast %33 : vector<8x1xf32> to vector<1x8x1xf32>
      %cst_25 = arith.constant dense<0.000000e+00> : vector<1xf32>
      %35 = vector.multi_reduction <add>, %34, %cst_25 [1, 2] : vector<1x8x1xf32> to vector<1xf32>
      %36 = vector.shape_cast %35 : vector<1xf32> to vector<1x1x1xf32>
      %37 = vector.extract %36[0, 0, 0] : f32 from vector<1x1x1xf32>
      %cst_26 = arith.constant 1.000000e+00 : f32
      %cst_27 = arith.constant 0.000000e+00 : f32
      %38 = vector.broadcast %cst_26 : f32 to vector<8x1xf32>
      %39 = vector.broadcast %cst_27 : f32 to vector<8x1xf32>
      %40 = arith.select %29, %38, %39 : vector<8x1xi1>, vector<8x1xf32>
      %41 = vector.shape_cast %40 : vector<8x1xf32> to vector<1x8x1xf32>
      %cst_28 = arith.constant dense<0.000000e+00> : vector<1xf32>
      %42 = vector.multi_reduction <add>, %41, %cst_28 [1, 2] : vector<1x8x1xf32> to vector<1xf32>
      %43 = vector.shape_cast %42 : vector<1xf32> to vector<1x1x1xf32>
      %44 = vector.extract %43[0, 0, 0] : f32 from vector<1x1x1xf32>
      %45 = vector.broadcast %37 : f32 to vector<1x8x128xf32>
      %c0_29 = arith.constant 0 : index
      %c0_30 = arith.constant 0 : index
      %c0_31 = arith.constant 0 : index
      %46 = vector.load %arg4[%c0_29, %c0_30, %c0_31] : memref<1x8x128xf32, #tpu.memory_space<vmem>>, vector<1x8x128xf32>
      tpu.vector_store %arg4[%c0_29, %c0_30, %c0_31], %45 {strides = array<i32>} : memref<1x8x128xf32, #tpu.memory_space<vmem>>, vector<1x8x128xf32>,
      %47 = vector.broadcast %44 : f32 to vector<1x8x128xf32>
      %c0_32 = arith.constant 0 : index
      %c0_33 = arith.constant 0 : index
      %c0_34 = arith.constant 0 : index
      %48 = vector.load %arg5[%c0_32, %c0_33, %c0_34] : memref<1x8x128xf32, #tpu.memory_space<vmem>>, vector<1x8x128xf32>
      tpu.vector_store %arg5[%c0_32, %c0_33, %c0_34], %47 {strides = array<i32>} : memref<1x8x128xf32, #tpu.memory_space<vmem>>, vector<1x8x128xf32>,
    } else {
    }
    return
  }
  func.func @transform_0(%arg0: i32, %arg1: i32) -> (i32, i32) {
    %c0_i32 = arith.constant 0 : i32
    return %arg0, %arg1 : i32, i32
  }
  func.func @transform_1(%arg0: i32, %arg1: i32) -> (i32, i32) {
    %c0_i32 = arith.constant 0 : i32
    return %arg0, %arg1 : i32, i32
  }
  func.func @transform_2(%arg0: i32, %arg1: i32) -> (i32, i32, i32) {
    %c0_i32 = arith.constant 0 : i32
    %c0_i32_0 = arith.constant 0 : i32
    %c0_i32_1 = arith.constant 0 : i32
    return %arg0, %c0_i32, %c0_i32_0 : i32, i32, i32
  }
  func.func @transform_3(%arg0: i32, %arg1: i32) -> (i32, i32, i32) {
    %c0_i32 = arith.constant 0 : i32
    %c0_i32_0 = arith.constant 0 : i32
    %c0_i32_1 = arith.constant 0 : i32
    return %arg0, %c0_i32, %c0_i32_0 : i32, i32, i32
  }
}

</mosaic_0001>

<bundles_post_ra>
// kernel: heatmap_loss_mse.1
= control target key start
LH: loop header
LB: loop body
LE: loop exit
PB: predicated region body
PF: predicated region fallthrough
CT: control target
= control target key end

     0   :  { %vm47_vm0 = vcmask 7168   ;;  %v86_v15 = vmov 0.0   ;;  %s125_s0 = inlined_call_operand.vmem [shape: f32[8,256], index: 0, kind: input, shape index: {}]   ;;  %s126_s1 = inlined_call_operand.vmem [shape: f32[8,256], index: 1, kind: input, shape index: {}]   ;;  %s127_s2 = inlined_call_operand.vmem [shape: f32[1,8,128], index: 2, kind: output, shape index: {0}]   ;;  %s128_s3 = inlined_call_operand.vmem [shape: f32[1,8,128], index: 3, kind: output, shape index: {1}]  }
   0x1   :  { %v19_v0 = vld [vmem:[%s126_s1] sm:$0xff]  ;;  %v23_v2 = vld [vmem:[%s126_s1 + $0x8] sm:$0xff] }
   0x2   :  { %v20_v1 = vld [vmem:[%s125_s0] sm:$0xff]  ;;  %v24_v4 = vld [vmem:[%s125_s0 + $0x8] sm:$0xff]  ;;  %v28_v9 = vadd.f32 %v23_v2, %v19_v0 }
   0x3   :  { %v21_v3 = vsub.f32 %v20_v1, %v19_v0  ;;  %v25_v5 = vsub.f32 %v24_v4, %v23_v2 }
   0x5   :  { %v22_v6 = vmul.f32 %v21_v3, %v21_v3  ;;  %v26_v7 = vmul.f32 %v25_v5, %v25_v5 }
   0x7   :  { %v27_v8 = vadd.f32 %v26_v7, %v22_v6 }
   0x9   :  { %39 = vadd.xlane.f32.xlu0 %v27_v8 }
   0xd   :  { %42 = vadd.xlane.f32.xlu0 %v28_v9 }
  0x92   :  { %v40_v10 = vpop.xlane.xlu0 %39 }
  0x93   :  { %v45_v11 = vmul.f32 0.00390625, %v40_v10 }
  0x96   :  { %v43_v12 = vpop.xlane.xlu0 %42 }
  0x97   :  { %vm44_vm1 = vcmp.gt.f32.partialorder %v43_v12, 0.0 }
  0x98   :  { %v46_v13 = vsel %vm44_vm1, %v45_v11, 0.0  ;;  %v58_v16 = vsel %vm44_vm1, 1.0, %v86_v15 }
  0x99   :  { %v48_v14 = vsel %vm47_vm0, %v46_v13, 0.0  ;;  %v59_v17 = vsel %vm47_vm0, %v58_v16, 0.0 }
  0x9a   :  { %49 = vadd.xlane.f32.xlu1 %v48_v14 }
  0x9e   :  { %60 = vadd.xlane.f32.xlu1 %v59_v17 }
 0x123   :  { %v50_v18 = vpop.xlane.xlu1 %49 }
 0x124   :  { %v51_v19 = vrot.slane %v50_v18, 4 }
 0x126   :  { %v52_v20 = vadd.f32 %v51_v19, %v50_v18 }
 0x127   :  { %v61_v21 = vpop.xlane.xlu1 %60 }
 0x128   :  { %v53_v22 = vrot.slane %v52_v20, 2  ;;  %v62_v23 = vrot.slane %v61_v21, 4 }
 0x12a   :  { %v63_v24 = vadd.f32 %v62_v23, %v61_v21  ;;  %v54_v25 = vadd.f32 %v53_v22, %v52_v20 }
 0x12c   :  { %v64_v26 = vrot.slane %v63_v24, 2  ;;  %v55_v27 = vrot.slane %v54_v25, 1 }
 0x12e   :  { %v65_v28 = vadd.f32 %v64_v26, %v63_v24  ;;  %v56_v29 = vadd.f32 %v55_v27, %v54_v25 }
 0x130   :  { %81 = vpush %v56_v29  ;;  %v66_v30 = vrot.slane %v65_v28, 1 }
 0x132   :  { %v67_v31 = vadd.f32 %v66_v30, %v65_v28 }
 0x134   :  { %83 = vpush %v67_v31 }
 0x161   :  { %s82_s0 = spop %81 }
 0x162   :  { %v69_v32 = vstv %s82_s0 }
 0x163   :  { %70 = vst [vmem:[%s127_s2] sm:$0xff] %v69_v32 }
 0x165   :  { %s84_s21 = spop %83 }
 0x166   :  { %v71_v33 = vstv %s84_s21 }
 0x167   :  { %72 = vst [vmem:[%s128_s3] sm:$0xff] %v71_v33 }

</bundles_post_ra>
